<compile_context>
chip_gen: v6e
topology: v6e:2x2x1
jax: 0.10.0
libtpu: 0.0.40
codegen_flags: <defaults>
</compile_context>

<pallas_src>
import math

import jax
import jax.numpy as jnp
import numpy as np
from jax.experimental import pallas as pl
from jax.experimental.pallas import tpu as pltpu


# --------------------------------------------------------------------------- #
# Kernels
# --------------------------------------------------------------------------- #
def _hyperboloid_store(y, exp_scale, o_ref):
    """Project rows y (tl, D) onto the Lorentz hyperboloid; write o_ref[0]."""
    y0 = y[:, 0:1]                                        # time pre-activation
    time = jax.nn.sigmoid(y0) * exp_scale + 1.1           # exp(scale) hoisted
    # Single XLU reduction: spatial norm = full norm minus the time column.
    sq = jnp.sum(y * y, axis=-1, keepdims=True) - y0 * y0
    sq = jnp.maximum(sq, 1e-8)                            # clamp_min
    sfac = jnp.sqrt((time * time - 1.0) / sq)
    o_ref[0] = y * sfac                                   # spatial part (full-tile store)
    o_ref[0, :, 0:1] = time                               # overwrite time column


def _lorentz_fused_kernel(ids_ref, pe_ref, tab_ref, w_ref, es_ref, o_ref):
    """Fused gather + LorentzLinear + hyperboloid projection for one block.

    ids_ref : (1, tl, 1) int32   token ids for this (batch, L-tile) block
    pe_ref  : (tl, D)    f32     positional encoding rows (bias folded in)
    tab_ref : (V, D)     f32     full embedding table, resident in VMEM
    w_ref   : (D, D)     f32     LorentzLinear weight, stored as (in, out)
    es_ref  : SMEM (1,)  f32     precomputed exp(scale)
    o_ref   : (1, tl, D) f32     output rows on the hyperboloid
    """
    ids = ids_ref[0]                                      # (tl, 1)
    rows = ids.shape[0]
    vocab = tab_ref.shape[0]
    # In-kernel gather via a one-hot selection matmul (vocab is VMEM-resident).
    onehot = (jax.lax.broadcasted_iota(jnp.int32, (rows, vocab), 1) == ids
              ).astype(jnp.float32)                       # (tl, V)
    x = jnp.dot(onehot, tab_ref[...], preferred_element_type=jnp.float32)
    y = jnp.dot(x, w_ref[...], preferred_element_type=jnp.float32) + pe_ref[...]
    _hyperboloid_store(y, es_ref[0], o_ref)


def _lorentz_kernel(x_ref, pe_ref, w_ref, es_ref, o_ref):
    """Pre-gathered fallback: x_ref is the (1, tl, D) embedding block."""
    y = jnp.dot(x_ref[0], w_ref[...],
                preferred_element_type=jnp.float32) + pe_ref[...]
    _hyperboloid_store(y, es_ref[0], o_ref)


# --------------------------------------------------------------------------- #
# Tiling / hardware helpers
# --------------------------------------------------------------------------- #
def _round_up(a, m):
    return ((a + m - 1) // m) * m


def _cores_per_chip():
    """Best-effort TensorCore count (2 on v7x, 1 on v5e/v6e); default 1."""
    try:
        info = pltpu.get_tpu_info()
        for name in ("num_cores", "num_tensorcores", "tensorcore_count",
                     "cores_per_chip"):
            v = getattr(info, name, None)
            if isinstance(v, int) and v > 0:
                return v
    except Exception:
        pass
    try:
        v = getattr(jax.devices()[0], "num_cores", None)
        if isinstance(v, int) and v > 0:
            return v
    except Exception:
        pass
    return 1


def _vmem_capacity_bytes():
    try:
        cap = getattr(pltpu.get_tpu_info(), "vmem_capacity_bytes", None)
        if isinstance(cap, int) and cap > 0:
            return cap
    except Exception:
        pass
    return 64 * 1024 * 1024      # conservative: v7x physical VMEM


def _choose_l_tile(L, B, target_rows, cores_per_chip):
    """Rows (L positions) per grid step, multiple of 8, as large as possible."""
    l8 = _round_up(max(L, 1), 8)
    tl = min(_round_up(max(target_rows, 8), 8), l8)
    # Only force a split along L when the chip has >1 TensorCore (v7x) AND the
    # batch grid axis alone cannot feed them AND each half keeps >= 512 rows.
    if cores_per_chip > 1 and B < cores_per_chip and l8 >= 2 * 512:
        half = _round_up((l8 + 1) // 2, 8)
        tl = min(tl, max(512, half))
    return max(tl, 8)


def _vmem_limit_bytes(tl, D, V, fused):
    """Scoped-VMEM request from the actual tile bytes (double-buffered)."""
    lane_pad = max(D, 128)                       # minor dim padded to 128 lanes
    blk = tl * lane_pad * 4
    est = 2 * blk                                # output blocks
    est += 2 * blk                               # pe blocks
    est += 2 * D * max(D, 128) * 4               # resident weight
    if fused:
        est += 2 * tl * 128 * 4                  # token-id blocks (lane padded)
        est += 2 * V * lane_pad * 4              # resident table
        est += 2 * tl * _round_up(V, 128) * 4    # in-kernel one-hot temporary
    else:
        est += 2 * blk                           # pre-gathered embedding blocks
    est = 2 * est + (4 << 20)                    # y/sq temporaries + headroom
    est = max(est, 16 << 20)                     # >= v5e default scoped limit
    return int(min(est, int(0.75 * _vmem_capacity_bytes())))


# --------------------------------------------------------------------------- #
# Wrapper
# --------------------------------------------------------------------------- #
def lorentz_embeddings_forward(source, params, *, target_rows_per_tile=2048,
                               fuse_gather=None):
    """source: (len, batch) int32 token ids -> (len, batch, dim) float32."""
    L, B = source.shape
    table = params["embedding"]
    V, D = table.shape
    max_len = params["pe"].shape[0]
    if L > max_len:
        raise ValueError(
            f"sequence length {L} exceeds positional-encoding max_len {max_len}")

    if fuse_gather is None:
        # Fuse the lookup when the table is small enough to sit resident in
        # VMEM and a one-hot over the vocab is cheap.
        fuse_gather = (V * D * 4 <= (2 << 20)) and (V <= 1024)

    cores = _cores_per_chip()
    tl = _choose_l_tile(L, B, target_rows_per_tile, cores)
    L_pad = _round_up(L, tl)
    num_l_tiles = L_pad // tl

    # pe with the LorentzLinear bias folded in (exact: one pe row per output row).
    pe_b = (params["pe"][:L, 0, :] + params["b"][None, :]).astype(jnp.float32)
    if L_pad != L:
        pe_b = jnp.pad(pe_b, ((0, L_pad - L), (0, 0)))

    w_t = params["w"].T.astype(jnp.float32)                   # (D_in, D_out)
    exp_scale = jnp.exp(params["scale"]).reshape(1).astype(jnp.float32)

    grid = (B, num_l_tiles)
    out_shape = jax.ShapeDtypeStruct((B, L_pad, D), jnp.float32)
    out_spec = pl.BlockSpec((1, tl, D), lambda b, i: (b, i, 0))
    pe_spec = pl.BlockSpec((tl, D), lambda b, i: (i, 0))
    w_spec = pl.BlockSpec((D, D), lambda b, i: (0, 0))         # resident
    smem_spec = pl.BlockSpec(memory_space=pltpu.SMEM)          # exp(scale)

    cparams = pltpu.CompilerParams(
        dimension_semantics=("parallel", "parallel"),
        vmem_limit_bytes=_vmem_limit_bytes(tl, D, V, fuse_gather))

    if fuse_gather:
        ids = source.T.astype(jnp.int32)                       # (B, L)
        if L_pad != L:
            ids = jnp.pad(ids, ((0, 0), (0, L_pad - L)))       # pad with token 0
        ids3 = ids[:, :, None]                                 # (B, L_pad, 1)
        out = pl.pallas_call(
            _lorentz_fused_kernel,
            out_shape=out_shape,
            grid=grid,
            in_specs=[
                pl.BlockSpec((1, tl, 1), lambda b, i: (b, i, 0)),  # token ids
                pe_spec,
                pl.BlockSpec((V, D), lambda b, i: (0, 0)),         # resident table
                w_spec,
                smem_spec,
            ],
            out_specs=out_spec,
            compiler_params=cparams,
        )(ids3, pe_b, table.astype(jnp.float32), w_t, exp_scale)
    else:
        # TODO(synk): for large vocabularies replace this XLA gather with a
        # scalar-prefetched, double-buffered manual DMA row gather from an
        # HBM-resident table (memory_space=pl.ANY) so the gathered (B, L, D)
        # slab is never materialized in HBM.
        x = table[source.T].astype(jnp.float32)                # (B, L, D)
        if L_pad != L:
            x = jnp.pad(x, ((0, 0), (0, L_pad - L), (0, 0)))
        out = pl.pallas_call(
            _lorentz_kernel,
            out_shape=out_shape,
            grid=grid,
            in_specs=[
                pl.BlockSpec((1, tl, D), lambda b, i: (b, i, 0)),
                pe_spec, w_spec, smem_spec,
            ],
            out_specs=out_spec,
            compiler_params=cparams,
        )(x, pe_b, w_t, exp_scale)

    # (B, L_pad, D) -> (L, B, D).  Layout plumbing only: the kernel computes in
    # a batch-major layout so pe tiles map 1:1 onto output rows.
    return out[:, :L, :].transpose(1, 0, 2)


# --------------------------------------------------------------------------- #
# Pure-JAX reference + parameter construction
# --------------------------------------------------------------------------- #
def reference_forward(source, params):
    """Pure-JAX reference matching the PyTorch module (eval mode)."""
    L = source.shape[0]
    emb = params["embedding"][source]                              # (L, B, D)
    pe = params["pe"][:L]                                          # (L, 1, D)
    y = emb @ params["w"].T + params["b"] + pe
    time = jax.nn.sigmoid(y[..., :1]) * jnp.exp(params["scale"]) + 1.1
    xn = y[..., 1:]
    sq = jnp.maximum(jnp.sum(xn * xn, axis=-1, keepdims=True), 1e-8)
    s = (time * time - 1.0) / sq
    return jnp.concatenate([time, xn * jnp.sqrt(s)], axis=-1)


def make_params(key, vocab_size, dim, max_len):
    k_emb, k_pe, k_w, k_b = jax.random.split(key, 4)

    # ManifoldParameter: random point on the Lorentz hyperboloid
    # (spatial ~ N(0, 0.02), time = sqrt(1 + ||spatial||^2)).
    spatial = 0.02 * jax.random.normal(k_emb, (vocab_size, dim - 1), jnp.float32)
    time0 = jnp.sqrt(1.0 + jnp.sum(spatial * spatial, axis=-1, keepdims=True))
    embedding = jnp.concatenate([time0, spatial], axis=-1)         # (V, D)

    # LorentzPositionEncoding: learnable pe = randn(max_len, 1, dim) * 0.02
    pe = 0.02 * jax.random.normal(k_pe, (max_len, 1, dim), jnp.float32)

    # LorentzLinear: nn.Linear(dim, dim) weight/bias + scalar scale = log(10)
    w = (1.0 / math.sqrt(dim)) * jax.random.normal(k_w, (dim, dim), jnp.float32)
    b = 0.01 * jax.random.normal(k_b, (dim,), jnp.float32)
    scale = jnp.array(math.log(10.0), jnp.float32)

    # TODO(synk): dropout layers (p=0 / p=0.1) are identity in eval mode and
    # are intentionally omitted (no stochastic path in this synthetic kernel).
    return {"embedding": embedding, "pe": pe, "w": w, "b": b, "scale": scale}


if __name__ == "__main__":
    VOCAB, MAX_LEN, DIM = 50, 64, 32

    key = jax.random.PRNGKey(0)
    k_params, k_src1, k_src2 = jax.random.split(key, 3)
    params = make_params(k_params, VOCAB, DIM, MAX_LEN)

    # Case 1: small aligned shape (len=8, batch=2), fused in-kernel gather.
    src1 = jax.random.randint(k_src1, (8, 2), 0, VOCAB, dtype=jnp.int32)
    out1 = jax.block_until_ready(lorentz_embeddings_forward(src1, params))
    ref1 = jax.block_until_ready(reference_forward(src1, params))
    np.testing.assert_allclose(np.asarray(out1), np.asarray(ref1),
                               rtol=1e-5, atol=1e-5)
    assert out1.shape == (8, 2, DIM)

    # Case 2: odd (len, batch) -> exercises L padding.
    src2 = jax.random.randint(k_src2, (25, 3), 0, VOCAB, dtype=jnp.int32)
    out2 = jax.block_until_ready(lorentz_embeddings_forward(src2, params))
    ref2 = jax.block_until_ready(reference_forward(src2, params))
    np.testing.assert_allclose(np.asarray(out2), np.asarray(ref2),
                               rtol=1e-5, atol=1e-5)
    assert out2.shape == (25, 3, DIM)

    # Case 3: pre-gathered fallback path (the large-vocab code path).
    out3 = jax.block_until_ready(
        lorentz_embeddings_forward(src2, params, fuse_gather=False))
    np.testing.assert_allclose(np.asarray(out3), np.asarray(ref2),
                               rtol=1e-5, atol=1e-5)

    print("KERNEL_OK")
</pallas_src>

<mosaic_0001>
module attributes {stable_mosaic.version = 11 : i64} {
  func.func @_lorentz_fused_kernel(%arg0: i32, %arg1: i32, %arg2: memref<1x8x1xi32, #tpu.memory_space<vmem>>, %arg3: memref<8x32xf32, #tpu.memory_space<vmem>>, %arg4: memref<50x32xf32, #tpu.memory_space<vmem>>, %arg5: memref<32x32xf32, #tpu.memory_space<vmem>>, %arg6: memref<1xf32, #tpu.memory_space<smem>>, %arg7: memref<1x8x32xf32, #tpu.memory_space<vmem>>) attributes {dimension_semantics = [#tpu.dimension_semantics<parallel>, #tpu.dimension_semantics<parallel>], iteration_bounds = array<i64: 2, 1>, scalar_prefetch = 0 : i64, scratch_operands = 0 : i64, tpu.core_type = #tpu.core_type<tc>, window_params = [{transform_indices = @transform_0, window_bounds = array<i64: 1, 8, 1>}, {transform_indices = @transform_1, window_bounds = array<i64: 8, 32>}, {pipeline_mode = #tpu.pipeline_mode<synchronous>, transform_indices = @transform_2, window_bounds = array<i64: 50, 32>}, {pipeline_mode = #tpu.pipeline_mode<synchronous>, transform_indices = @transform_3, window_bounds = array<i64: 32, 32>}, {transform_indices = @transform_4, window_bounds = array<i64: 1>}, {transform_indices = @transform_5, window_bounds = array<i64: 1, 8, 32>}]} {
    %c0 = arith.constant 0 : index
    %c0_0 = arith.constant 0 : index
    %c0_1 = arith.constant 0 : index
    %0 = vector.load %arg2[%c0, %c0_0, %c0_1] : memref<1x8x1xi32, #tpu.memory_space<vmem>>, vector<1x8x1xi32>
    %1 = vector.shape_cast %0 : vector<1x8x1xi32> to vector<8x1xi32>
    %2 = tpu.iota {dimensions = array<i32: 1>} : vector<8x50xi32>
    %3 = vector.broadcast %1 : vector<8x1xi32> to vector<8x50xi32>
    %4 = arith.cmpi eq, %2, %3 : vector<8x50xi32>
    %5 = arith.extui %4 : vector<8x50xi1> to vector<8x50xi32>
    %6 = arith.sitofp %5 : vector<8x50xi32> to vector<8x50xf32>
    %c0_2 = arith.constant 0 : index
    %c0_3 = arith.constant 0 : index
    %7 = vector.load %arg4[%c0_2, %c0_3] : memref<50x32xf32, #tpu.memory_space<vmem>>, vector<50x32xf32>
    %cst = arith.constant dense<0.000000e+00> : vector<8x32xf32>
    %8 = tpu.matmul %6, %7, %cst {dimension_numbers = #tpu.dot_dimension_numbers<[1], [0], [0], [1], [0, 0, 1, 1], [], []>} : vector<8x50xf32>, vector<50x32xf32>, vector<8x32xf32> -> vector<8x32xf32>
    %c0_4 = arith.constant 0 : index
    %c0_5 = arith.constant 0 : index
    %9 = vector.load %arg5[%c0_4, %c0_5] : memref<32x32xf32, #tpu.memory_space<vmem>>, vector<32x32xf32>
    %cst_6 = arith.constant dense<0.000000e+00> : vector<8x32xf32>
    %10 = tpu.matmul %8, %9, %cst_6 {dimension_numbers = #tpu.dot_dimension_numbers<[1], [0], [0], [1], [0, 0, 1, 1], [], []>} : vector<8x32xf32>, vector<32x32xf32>, vector<8x32xf32> -> vector<8x32xf32>
    %c0_7 = arith.constant 0 : index
    %c0_8 = arith.constant 0 : index
    %11 = vector.load %arg3[%c0_7, %c0_8] : memref<8x32xf32, #tpu.memory_space<vmem>>, vector<8x32xf32>
    %12 = arith.addf %10, %11 : vector<8x32xf32>
    %c0_9 = arith.constant 0 : index
    %13 = memref.load %arg6[%c0_9] : memref<1xf32, #tpu.memory_space<smem>>
    %14 = vector.extract_strided_slice %12 {offsets = [0, 0], sizes = [8, 1], strides = [1, 1]} : vector<8x32xf32> to vector<8x1xf32>
    %15 = arith.negf %14 : vector<8x1xf32>
    %16 = math.exp %15 : vector<8x1xf32>
    %cst_10 = arith.constant 1.000000e+00 : f32
    %17 = vector.broadcast %cst_10 : f32 to vector<8x1xf32>
    %18 = arith.addf %17, %16 : vector<8x1xf32>
    %19 = arith.divf %17, %18 : vector<8x1xf32>
    %20 = vector.broadcast %13 : f32 to vector<8x1xf32>
    %21 = arith.mulf %19, %20 : vector<8x1xf32>
    %cst_11 = arith.constant 1.100000e+00 : f32
    %22 = vector.broadcast %cst_11 : f32 to vector<8x1xf32>
    %23 = arith.addf %21, %22 : vector<8x1xf32>
    %24 = arith.mulf %12, %12 : vector<8x32xf32>
    %cst_12 = arith.constant dense<0.000000e+00> : vector<8xf32>
    %25 = vector.multi_reduction <add>, %24, %cst_12 [1] : vector<8x32xf32> to vector<8xf32>
    %26 = vector.shape_cast %25 : vector<8xf32> to vector<8x1xf32>
    %27 = arith.mulf %14, %14 : vector<8x1xf32>
    %28 = arith.subf %26, %27 : vector<8x1xf32>
    %cst_13 = arith.constant 9.99999993E-9 : f32
    %29 = vector.broadcast %cst_13 : f32 to vector<8x1xf32>
    %30 = arith.maximumf %28, %29 : vector<8x1xf32>
    %31 = arith.mulf %23, %23 : vector<8x1xf32>
    %cst_14 = arith.constant 1.000000e+00 : f32
    %32 = vector.broadcast %cst_14 : f32 to vector<8x1xf32>
    %33 = arith.subf %31, %32 : vector<8x1xf32>
    %34 = arith.divf %33, %30 : vector<8x1xf32>
    %35 = math.sqrt %34 : vector<8x1xf32>
    %36 = vector.broadcast %35 : vector<8x1xf32> to vector<8x32xf32>
    %37 = arith.mulf %12, %36 : vector<8x32xf32>
    %c0_15 = arith.constant 0 : index
    %c0_16 = arith.constant 0 : index
    %c0_17 = arith.constant 0 : index
    %38 = vector.load %arg7[%c0_15, %c0_16, %c0_17] : memref<1x8x32xf32, #tpu.memory_space<vmem>>, vector<1x8x32xf32>
    %39 = vector.shape_cast %38 : vector<1x8x32xf32> to vector<8x32xf32>
    %40 = vector.shape_cast %37 : vector<8x32xf32> to vector<1x8x32xf32>
    tpu.vector_store %arg7[%c0_15, %c0_16, %c0_17], %40 {strides = array<i32>} : memref<1x8x32xf32, #tpu.memory_space<vmem>>, vector<1x8x32xf32>,
    %c0_18 = arith.constant 0 : index
    %c0_19 = arith.constant 0 : index
    %c0_20 = arith.constant 0 : index
    %41 = vector.load %arg7[%c0_18, %c0_19, %c0_20] : memref<1x8x32xf32, #tpu.memory_space<vmem>>, vector<1x8x1xf32>
    %42 = vector.shape_cast %41 : vector<1x8x1xf32> to vector<8x1xf32>
    %43 = vector.shape_cast %23 : vector<8x1xf32> to vector<1x8x1xf32>
    tpu.vector_store %arg7[%c0_18, %c0_19, %c0_20], %43 {strides = array<i32>} : memref<1x8x32xf32, #tpu.memory_space<vmem>>, vector<1x8x1xf32>,
    return
  }
  func.func @transform_0(%arg0: i32, %arg1: i32) -> (i32, i32, i32) {
    %c0_i32 = arith.constant 0 : i32
    %c0_i32_0 = arith.constant 0 : i32
    return %arg0, %arg1, %c0_i32 : i32, i32, i32
  }
  func.func @transform_1(%arg0: i32, %arg1: i32) -> (i32, i32) {
    %c0_i32 = arith.constant 0 : i32
    %c0_i32_0 = arith.constant 0 : i32
    return %arg1, %c0_i32 : i32, i32
  }
  func.func @transform_2(%arg0: i32, %arg1: i32) -> (i32, i32) {
    %c0_i32 = arith.constant 0 : i32
    %c0_i32_0 = arith.constant 0 : i32
    %c0_i32_1 = arith.constant 0 : i32
    return %c0_i32, %c0_i32_0 : i32, i32
  }
  func.func @transform_3(%arg0: i32, %arg1: i32) -> (i32, i32) {
    %c0_i32 = arith.constant 0 : i32
    %c0_i32_0 = arith.constant 0 : i32
    %c0_i32_1 = arith.constant 0 : i32
    return %c0_i32, %c0_i32_0 : i32, i32
  }
  func.func @transform_4(%arg0: i32, %arg1: i32) -> i32 {
    %c0_i32 = arith.constant 0 : i32
    %c0_i32_0 = arith.constant 0 : i32
    return %c0_i32 : i32
  }
  func.func @transform_5(%arg0: i32, %arg1: i32) -> (i32, i32, i32) {
    %c0_i32 = arith.constant 0 : i32
    %c0_i32_0 = arith.constant 0 : i32
    return %arg0, %arg1, %c0_i32 : i32, i32, i32
  }
}

</mosaic_0001>

<bundles_post_ra>
// kernel: tpu_custom_call.1
= control target key start
LH: loop header
LB: loop body
LE: loop exit
PB: predicated region body
PF: predicated region fallthrough
CT: control target
= control target key end

     0   :  { %s959_s0 = inlined_call_operand.vmem [shape: s32[2,8,1], index: 0, kind: input, shape index: {}]   ;;  %s960_s1 = inlined_call_operand.vmem [shape: f32[8,32], index: 1, kind: input, shape index: {}]   ;;  %s961_s2 = inlined_call_operand.vmem [shape: f32[50,32], index: 2, kind: input, shape index: {}]   ;;  %s962_s3 = inlined_call_operand.vmem [shape: f32[32,32], index: 3, kind: input, shape index: {}]   ;;  %s963_s4 = inlined_call_operand.<no memory space> [shape: f32[1], index: 4, kind: input, shape index: {}]   ;;  %s964_s5 = inlined_call_operand.hbm [shape: f32[2,8,32], index: 5, kind: output, shape index: {}]  }
   0x1   :  { %10 = sst [smem:[#allocation2]] %s963_s4 }
   0x2   :  { %11 = vsyncpa [#allocation4], 0 }
   0x3   :  { %13 = vsyncpa [#allocation4 + $0x1], 0  ;;  %s815_s20 = smov 0   ;;  %s817_s21 = smov 0  }
   0x4   :  { %s819_s22 = smov 0   ;;  %s821_s23 = smov 0  }
   0x5   :  { %s823_s24 = smov 0   ;;  %s825_s25 = smov 0  }
   0x6 LB: > { %s573_s4 = sadd.s32 4294967295, %s776_s25   ;;  %s574_s26 = sadd.s32 4294967294, %s776_s25   ;;  %s776_s25 = sphi %s825_s25, %s19_s25   ;;  %s772_s24 = sphi %s823_s24, %s971_s24   ;;  %s768_s23 = sphi %s821_s23, %s970_s23   ;;  %s764_s22 = sphi %s819_s22, %s969_s22   ;;  %s760_s21 = sphi %s817_s21, %s968_s21   ;;  %s756_s20 = sphi %s815_s20, %s967_s20  }
   0x7   : > { %s31_s27 = sadd.s32 1, %s772_s24  ;;  %s157_s28 = sadd.s32 1, %s764_s22 }
   0x8   : > { %p33_p0 = scmp.ge.s32.totalorder %s31_s27, 2  ;;  %p167_p1 = scmp.ne.s32.totalorder %s764_s22, %s760_s21 }
   0x9   : > { %p168_p2 = scmp.eq.s32.totalorder %s573_s4, 1  ;;  %p173_p3 = scmp.ne.s32.totalorder %s760_s21, %s756_s20 }
   0xa   : > { %s973_s27 = smov (%p33_p0, %s31_s27), 0  ;;  %p174_p5 = scmp.eq.s32.totalorder %s574_s26, 1 }
   0xb   : > { %p855_p4 = por %p168_p2, %p167_p1  ;;  %s152_s30 = ssub.s32 %s772_s24, %s973_s27 }
   0xc   : > { %p578_p6 = scmp.ge.s32.totalorder %s776_s25, 1  ;;  %p155_p7 = scmp.eq.s32.totalorder %s152_s30, 0 }
   0xd   : > { %p862_p8 = por %p174_p5, %p173_p3  ;;  %p218_p9 = scmp.lt.s32.totalorder %s776_s25, 3 }
   0xe   : > { %s868_s7 = scalar_select %p155_p7, %s764_s22, %s157_s28  }
   0xf   : > { %p219_p10 = pnand %p578_p6, %p218_p9 }
  0x10   : > { %p252_p11 = scmp.lt.s32.totalorder (!%p219_p10), %s768_s23, 1  ;;  %s436_s26 = sld [smem:[#allocation2]] (!%p219_p10) }
  0x11   : > { %222 = sbr.rel (%p219_p10) target bundleno = 862 (0x35e), region = 40  ;;  %s249_s28 = sand.u32 (!%p219_p10), 1, %s760_s21  }
  0x12   : > { %s579_s30 = sshll.u32 (!%p219_p10), %s249_s28, 3  ;;  %s588_s8 = sshll.u32 (!%p219_p10), %s768_s23, 7 }
  0x13   : > { %s251_s9 = scalar_lea.vmem (!%p219_p10), [#allocation3], %s579_s30  ;;  %s918_s13 = scalar_lea.hbm (!%p219_p10), %s964_s5, %s588_s8 }
  0x14   : > { %s487_s10 = sshll.u32 (!%p219_p10), %s251_s9, 4  ;;  %s473_s14 = scalar_lea.sflag (!%p219_p10), [#allocation4], %s249_s28  ;;  %s488_s10 = int_to_ptr.vmem [resolvable:$true] %s487_s10 }
  0x16   : > { %v278_v0 = vld [vmem:[%s961_s2 + $0x30] sm:$0x3]  ;;  %vm283_vm0 = vcmask 1041408   ;;  %v778_v1 = vmov 0   ;;  %v779_v2 = vmov 0.0   ;;  %v277_v3 = vld [vmem:[%s961_s2 + $0x28] sm:$0xff]  ;;  %v264_v13 = vlaneseq }
  0x17   : > { %690 = vset.pattern.permute.xlu0 %v778_v1  ;;  %604 = vmatprep.subr.mxu0 %v779_v2  ;;  %s253_s12 = scalar_select %p252_p11, %s768_s23, 1  ;;  %v276_v4 = vld [vmem:[%s961_s2 + $0x20] sm:$0xff]  ;;  %vm780_vm1 = vmmov 0   ;;  %v275_v5 = vld [vmem:[%s961_s2 + $0x18] sm:$0xff]  ;;  %v359_v8 = vld [vmem:[%s962_s3 + $0x10] sm:$0xff]  ;;  %vm279_vm2 = vcmask 408576   ;;  %v443_v32 = vstv %s436_s26 }
  0x18   : > { %605 = vmatpush3.msk.msra.mxu0 %vm283_vm0, %v278_v0  ;;  %621 = vmatprep.subr.mxu1 %v779_v2  ;;  %v360_v6 = vld [vmem:[%s962_s3 + $0x18] sm:$0xff]  ;;  %v274_v9 = vld [vmem:[%s961_s2 + $0x10] sm:$0xff]  ;;  %v358_v10 = vld [vmem:[%s962_s3 + $0x8] sm:$0xff]  ;;  %v265_v14 = vand.u32 127, %v264_v13  ;;  %vm362_vm4 = vcmask 261120   ;;  %vm470_vm7 = vcmask 7168  }
  0x19   : > { %606 = vmatprep.subr.mxu0 %v779_v2  ;;  %691 = vset.pattern.permute.xlu1 %v778_v1  ;;  %s580_s15 = sshll.u32 %s253_s12, 3  ;;  %v273_v11 = vld [vmem:[%s961_s2 + $0x8] sm:$0xff]  ;;  %v272_v12 = vld [vmem:[%s961_s2] sm:$0xff]  ;;  %s781_s23 = smov [#allocation3]  }
  0x1a   : > { %607 = vmatpush3.msra.mxu0 %v277_v3  ;;  %618 = vmatprep.mubr.msk.f32.mxu0 %vm780_vm1, %v779_v2  ;;  %s258_s18 = scalar_lea.vmem %s959_s0, %s580_s15  ;;  %v357_v17 = vld [vmem:[%s962_s3] sm:$0xff]  ;;  %s700_s15 = scalar_lea.vmem %s488_s10, 128 }
  0x1b   : > { %608 = vmatprep.subr.mxu0 %v779_v2  ;;  %629 = vmatprep.mubr.msk.f32.mxu1 %vm780_vm1, %v779_v2  ;;  %v263_v7 = vld [vmem:[%s258_s18] sm:$0xff]  ;;  %p701_p12 = scmp.ne.s32.totalorder %s488_s10, %s700_s15  ;;  %s704_s16 = sshll.u32 %s781_s23, 4  ;;  %s705_s16 = int_to_ptr.vmem [resolvable:$false] %s704_s16 }
  0x1c   : > { %609 = vmatpush3.msra.mxu0 %v276_v4  ;;  %622 = vmatpush3.msra.mxu1 %v360_v6  ;;  %v361_v20 = vld [vmem:[%s960_s1] sm:$0xff]  ;;  %s706_s17 = scalar_lea.vmem %s705_s16, 256  ;;  %p707_p1 = scmp.lt.s32.totalorder %s488_s10, %s705_s16 }
  0x1d   : > { %267 = vperm.xlu0 %690, %v263_v7   ;;  %610 = vmatprep.subr.mxu0 %v779_v2  ;;  %p702_p13 = pnand %p701_p12, %p855_p4  ;;  %p708_p2 = scmp.lt.s32.totalorder %s706_s17, %s700_s15 }
  0x1e   : > { %611 = vmatpush3.msra.mxu0 %v275_v5  ;;  %623 = vmatprep.subr.mxu1 %v779_v2 }
  0x1f   : > { %612 = vmatprep.subr.mxu0 %v779_v2  ;;  %624 = vmatpush3.msra.mxu1 %v359_v8  ;;  %p703_p0 = pneg %p702_p13  ;;  %p709_p3 = por %p708_p2, %p707_p1 }
  0x20   : > { %613 = vmatpush3.msra.mxu0 %v274_v9  ;;  %625 = vmatprep.subr.mxu1 %v779_v2 }
  0x21   : > { %614 = vmatprep.subr.mxu0 %v779_v2  ;;  %626 = vmatpush3.msra.mxu1 %v358_v10  ;;  %p710_p5 = pnand %p709_p3, %p703_p0 }
  0x22   : > { %615 = vmatpush3.msra.mxu0 %v273_v11  ;;  %627 = vmatprep.subr.mxu1 %v779_v2 }
  0x23   : > { %616 = vmatprep.subr.mxu0 %v779_v2  ;;  %628 = vmatpush3.msra.mxu1 %v357_v17 }
  0x24   : > { %617 = vmatpush3.msra.mxu0 %v272_v12 }
  0x98   : > { %v268_v15 = vpop.permute.xlu0 %267 }
  0x99   : > { %vm269_vm3 = vcmp.eq.s32.totalorder %v265_v14, %v268_v15 }
  0x9a   : > { %v581_v16 = vsel %vm269_vm3, 1.0, %v779_v2 }
  0x9b   : > { %619 = vmatmul.mubr.msk.f32.vlgmr.msra.gmra.mxu0 %vm279_vm2, %v581_v16 }
 0x15b   : > { %v353_v18 = vpop.f32.mrf.mxu0 }
 0x15c   : > { %630 = vmatmul.mubr.msk.f32.vlgmr.msra.gmra.mxu1 %vm362_vm4, %v353_v18 }
 0x15d   : > { %v620_v19 = vpop.f32.mrf.mxu0 }
 0x21c   : > { %v432_v21 = vpop.f32.mrf.mxu1 }
 0x21d   : > { %v433_v22 = vadd.f32 %v432_v21, %v361_v20 }
 0x21e   : > { %v631_v23 = vpop.f32.mrf.mxu1 }
 0x21f   : > { %v446_v24 = vmul.f32 %v433_v22, %v433_v22  ;;  %v585_v26 = vmul.f32 -1.442695, %v433_v22 }
 0x221   : > { %v447_v25 = vsel %vm362_vm4, %v446_v24, 0.0  ;;  %692 = vpow2.f32 %v585_v26 }
 0x222   : > { %448 = vadd.xlane.f32.xlu0 %v447_v25 }
 0x22e   : > { %v693_v27 = vpop.eup %692 }
 0x22f   : > { %v440_v28 = vadd.f32 1.0, %v693_v27 }
 0x231   : > { %694 = vrcp.f32 %v440_v28 }
 0x23e   : > { %v695_v31 = vpop.eup %694 }
 0x23f   : > { %v444_v34 = vmul.f32 %v695_v31, %v443_v32 }
 0x241   : > { %v445_v35 = vadd.f32 1.1, %v444_v34 }
 0x243   : > { %v452_v36 = vmul.f32 %v445_v35, %v445_v35 }
 0x245   : > { %v586_v37 = vadd.f32 -1.0, %v452_v36 }
 0x2ab   : > { %v449_v29 = vpop.xlane.xlu0 %448 }
 0x2ac   : > { %v450_v30 = vsub.f32 %v449_v29, %v446_v24 }
 0x2ae   : > { %v451_v33 = vmax.f32 %v450_v30, 1e-08 }
 0x2b0   : > { %696 = vrcp.f32 %v451_v33 }
 0x2bd   : > { %v697_v38 = vpop.eup %696 }
 0x2be   : > { %v455_v39 = vmul.f32 %v697_v38, %v586_v37 }
 0x2c0   : > { %698 = vrsqrt.f32 %v455_v39  ;;  %vm458_vm5 = vcmp.eq.f32.partialorder %v455_v39, inf  ;;  %v461_v42 = vand.u32 2147483648, %v455_v39  ;;  %vm460_vm6 = vcmp.eq.f32.partialorder %v455_v39, 0.0 }
 0x2cd   : > { %v699_v40 = vpop.eup %698 }
 0x2ce   : > { %v457_v41 = vmul.f32 %v699_v40, %v455_v39 }
 0x2d0   : > { %v459_v43 = vsel %vm458_vm5, %v455_v39, %v457_v41 }
 0x2d1   : > { %v462_v44 = vsel %vm460_vm6, %v461_v42, %v459_v43 }
 0x2d2   : > { %465 = vperm.xlu1 %691, %v462_v44  }
 0x34d   : > { %v466_v45 = vpop.permute.xlu1 %465 }
 0x34e   : > { %v468_v46 = vmul.f32 %v466_v45, %v433_v22 }
 0x350   : > { %469 = vst.msk [vmem:[%s251_s9] sm:$0xff] %vm362_vm4, %v468_v46 }
 0x351   : > { %471 = vst.msk [vmem:[%s251_s9] sm:$0xff] %vm470_vm7, %v445_v35 }
 0x352   : > { %713 = shalt.err (!%p710_p5)
}
 0x353   : > { %s714_s18 = scalar_lea.hbm %s918_s13, 128  ;;  %s718_s26 = scalar_lea.hbm %s964_s5, 256 }
 0x354   : > { %p715_p6 = scmp.ne.s32.totalorder %s918_s13, %s714_s18  ;;  %p719_p10 = scmp.lt.s32.totalorder %s918_s13, %s964_s5 }
 0x355   : > { %p720_p11 = scmp.lt.s32.totalorder %s718_s26, %s714_s18 }
 0x356   : > { %p716_p7 = pnand %p715_p6, %p855_p4 }
 0x357   : > { %p721_p12 = por %p720_p11, %p719_p10 }
 0x358   : > { %p717_p9 = pneg %p716_p7 }
 0x35a   : > { %p722_p13 = pnand %p721_p12, %p717_p9 }
 0x35c   : > { %725 = shalt.err (!%p722_p13)
}
 0x35d   : > { %632 = dma.vmem_to_hbm [thread:$0]  (%p855_p4), %s488_s10, 128, %s918_s13, %s473_s14  }
 0x35e PF: > { %p638_p0 = scmp.ge.s32.totalorder %s776_s25, 2  ;;  %s499_s8 = sand.u32 1, %s756_s20  }
 0x35f   : > { %s500_s9 = scalar_lea.sflag [#allocation4], %s499_s8 }
 0x360   : > { %p635_p1 = pnand %p638_p0, %p862_p8 }
 0x362   : > { %p636_p2 = pneg %p635_p1 }
 0x364   : > { %751 = dma.done.wait (%p636_p2), %s500_s9, 128  }
 0x365   : > { %753 = vsyncadd (%p636_p2), %s500_s9, 4294967168  ;;  %s19_s25 = sadd.s32 1, %s776_s25   ;;  %s967_s20 = smov %s760_s21 }
 0x366   : > { %p16_p3 = scmp.ge.s32.totalorder %s19_s25, 4   ;;  %s968_s21 = smov %s764_s22 }
 0x367   : > { %s969_s22 = smov %s868_s7  ;;  %s970_s23 = smov %s772_s24 }
 0x368   : > { %s971_s24 = smov %s973_s27  ;;  %18 = sbr.rel (!%p16_p3) target bundleno = 6 (0x6), region = 78 }
 0x36d   :  { %505 = vsyncpa [#allocation4], 1 }
 0x36e   :  { %507 = vsyncpa [#allocation4 + $0x1], 1 }

</bundles_post_ra>
